<compile_context>
chip_gen: v7x
topology: tpu7x:2x2x1
jax: 0.10.0
libtpu: 0.0.40
codegen_flags: <defaults>
</compile_context>

<pallas_src>
import jax
import jax.numpy as jnp
from jax.experimental import pallas as pl
from jax.experimental.pallas import tpu as pltpu

LANE = 128   # lane width (last dim)
SUB = 8      # sublane width (second-to-last dim)


def _round_up(n, m):
    return ((n + m - 1) // m) * m


def _pick_tm(B, tm, min_steps):
    """Large tiles amortize per-step overhead; >= min_steps steps keeps both
    v7x TensorCores busy on the parallel batch axis."""
    full = _round_up(B, SUB)
    if tm is None:
        tm = min(2048, _round_up(pl.cdiv(B, max(min_steps, 1)), SUB))
    tm = max(SUB, min(_round_up(tm, SUB), full))
    return tm


def mlp_kernel(x_ref,
               w_in_ref, b_in_ref,
               w_hid_ref, b_hid_ref,
               w_out_ref, b_out_ref,
               o_ref):
    compute_dtype = w_hid_ref.dtype
    # fc_in: (tm, in_dim) x (in_dim, Hp) in f32, f32 bias+ReLU epilogue (v5e-safe)
    a = jnp.dot(x_ref[...], w_in_ref[...], preferred_element_type=jnp.float32)
    h = jnp.maximum(a + b_in_ref[...], 0.0).astype(compute_dtype)
    # hidden layers (statically unrolled), bf16/f32 matmul inputs, f32 accumulation
    for l in range(w_hid_ref.shape[0]):
        a = jnp.dot(h, w_hid_ref[l], preferred_element_type=jnp.float32)
        h = jnp.maximum(a + b_hid_ref[l], 0.0).astype(compute_dtype)
    # fc_out (no activation); narrow (tm, out_dim) store -> 64x fewer HBM bytes
    out = jnp.dot(h, w_out_ref[...], preferred_element_type=jnp.float32)
    o_ref[...] = (out + b_out_ref[...]).astype(o_ref.dtype)


def prepare_params(params, compute_dtype=jnp.bfloat16):
    """One-time preprocessing (hoisted out of the per-call path).

    params: flat list [w_in, b_in, w_h0, b_h0, ..., w_out, b_out] with weights
    stored (fan_in, fan_out) and biases (1, fan_out).

    Pads the hidden dim to a multiple of 128 (exact for Linear+ReLU: padded
    rows/cols contribute exact zeros), casts hidden/out weights to
    compute_dtype (fc_in weight stays f32), keeps all biases f32 for the
    epilogue, and stacks the hidden layers into single slabs.
    """
    w_in, b_in = params[0], params[1]
    w_out, b_out = params[-2], params[-1]
    hid_ws = params[2:-2:2]
    hid_bs = params[3:-2:2]
    assert len(hid_ws) >= 1, "expects at least one hidden layer"

    in_dim, hidden = w_in.shape
    out_dim = w_out.shape[1]
    hp = _round_up(hidden, LANE)

    def padw(a, rows, cols):
        return jnp.pad(a, ((0, rows - a.shape[0]), (0, cols - a.shape[1])))

    w_in_p = padw(w_in, in_dim, hp).astype(jnp.float32)                            # (in_dim, Hp)
    b_in_p = padw(b_in, 1, hp).astype(jnp.float32)                                 # (1, Hp)
    w_hid_p = jnp.stack([padw(w, hp, hp) for w in hid_ws]).astype(compute_dtype)   # (nb, Hp, Hp)
    b_hid_p = jnp.stack([padw(b, 1, hp) for b in hid_bs]).astype(jnp.float32)      # (nb, 1, Hp)
    w_out_p = padw(w_out, hp, out_dim).astype(compute_dtype)                       # (Hp, out_dim)
    b_out_p = b_out.astype(jnp.float32)                                            # (1, out_dim)

    return {
        "tensors": (w_in_p, b_in_p, w_hid_p, b_hid_p, w_out_p, b_out_p),
        "dims": (in_dim, hidden, out_dim, len(hid_ws)),
    }


def mlp_forward(x, prepared, *, tm=None, min_steps=2):
    """x: (B, in_dim).  prepared: output of prepare_params()."""
    w_in_p, b_in_p, w_hid_p, b_hid_p, w_out_p, b_out_p = prepared["tensors"]
    in_dim, hidden, out_dim, nb_hidden = prepared["dims"]
    B, x_in = x.shape
    assert x_in == in_dim, (x_in, in_dim)

    x = x.astype(jnp.float32)
    tm = _pick_tm(B, tm, min_steps)
    grid = (pl.cdiv(B, tm),)      # boundary block masked by Pallas if tm doesn't divide B

    # Advisory cost estimate, using the real (unpadded) model sizes.
    wsize = jnp.dtype(w_hid_p.dtype).itemsize
    flops = 2 * B * (in_dim * hidden + nb_hidden * hidden * hidden + hidden * out_dim)
    param_bytes = ((in_dim * hidden + hidden) * 4
                   + nb_hidden * (hidden * hidden * wsize + hidden * 4)
                   + hidden * out_dim * wsize + out_dim * 4)
    bytes_accessed = int(B * in_dim * 4 + param_bytes + B * out_dim * 4)

    out = pl.pallas_call(
        mlp_kernel,
        out_shape=jax.ShapeDtypeStruct((B, out_dim), jnp.float32),
        grid=grid,
        in_specs=[
            pl.BlockSpec((tm, in_dim), lambda i: (i, 0)),        # streamed x, natural width
            pl.BlockSpec(w_in_p.shape, lambda i: (0, 0)),        # VMEM-resident weights/biases
            pl.BlockSpec(b_in_p.shape, lambda i: (0, 0)),
            pl.BlockSpec(w_hid_p.shape, lambda i: (0, 0, 0)),
            pl.BlockSpec(b_hid_p.shape, lambda i: (0, 0, 0)),
            pl.BlockSpec(w_out_p.shape, lambda i: (0, 0)),
            pl.BlockSpec(b_out_p.shape, lambda i: (0, 0)),
        ],
        out_specs=pl.BlockSpec((tm, out_dim), lambda i: (i, 0)),  # narrow output block
        compiler_params=pltpu.CompilerParams(
            dimension_semantics=("parallel",)),
        cost_estimate=pl.CostEstimate(
            flops=int(flops), transcendentals=0, bytes_accessed=bytes_accessed),
    )(x, w_in_p, b_in_p, w_hid_p, b_hid_p, w_out_p, b_out_p)

    return out


def init_params(key, in_dim=8, out_dim=2, nb_hidden=3, hidden_dim=30):
    """Deterministic init mimicking nn.Linear default U(-1/sqrt(fan_in), 1/sqrt(fan_in)).
    Weights stored as (fan_in, fan_out); biases as (1, fan_out)."""
    dims = [(in_dim, hidden_dim)] + [(hidden_dim, hidden_dim)] * nb_hidden + [(hidden_dim, out_dim)]
    params = []
    for fan_in, fan_out in dims:
        key, kw, kb = jax.random.split(key, 3)
        bound = 1.0 / jnp.sqrt(fan_in)
        w = jax.random.uniform(kw, (fan_in, fan_out), jnp.float32, -bound, bound)
        b = jax.random.uniform(kb, (1, fan_out), jnp.float32, -bound, bound)
        params += [w, b]
    return params


def mlp_ref(x, params):
    h = x
    for i in range(0, len(params) - 2, 2):
        h = jnp.maximum(h @ params[i] + params[i + 1], 0.0)
    return h @ params[-2] + params[-1]


if __name__ == "__main__":
    key = jax.random.PRNGKey(0)
    key, kx = jax.random.split(key)
    batch, in_dim, out_dim, nb_hidden, hidden_dim = 16, 8, 2, 3, 30
    x = jax.random.normal(kx, (batch, in_dim), jnp.float32)

    params = init_params(key, in_dim=in_dim, out_dim=out_dim,
                         nb_hidden=nb_hidden, hidden_dim=hidden_dim)
    ref = mlp_ref(x, params)

    # f32 path (tight tolerance); default tm gives a 2-step parallel batch grid
    prep_f32 = prepare_params(params, compute_dtype=jnp.float32)
    out_f32 = jax.block_until_ready(mlp_forward(x, prep_f32))
    assert out_f32.shape == (batch, out_dim), out_f32.shape
    assert jnp.allclose(out_f32, ref, atol=1e-5, rtol=1e-5), "f32 mismatch vs reference"

    # default bf16 matmul-input path (v6e/v7x MXU), f32 accumulation + f32 epilogue
    prep_bf16 = prepare_params(params)  # compute_dtype=jnp.bfloat16
    out_bf16 = jax.block_until_ready(mlp_forward(x, prep_bf16))
    assert out_bf16.shape == (batch, out_dim), out_bf16.shape
    assert jnp.allclose(out_bf16, ref, atol=5e-2, rtol=5e-2), "bf16 mismatch vs reference"

    # ragged batch (B not a multiple of tm): Pallas masks the boundary block
    x13 = x[:13]
    out_r = jax.block_until_ready(mlp_forward(x13, prep_f32, tm=8))
    assert out_r.shape == (13, out_dim), out_r.shape
    assert jnp.allclose(out_r, ref[:13], atol=1e-5, rtol=1e-5), "ragged-batch mismatch"

    print("KERNEL_OK")
</pallas_src>

<mosaic_0001>
module attributes {stable_mosaic.version = 11 : i64} {
  func.func @mlp_kernel(%arg0: i32, %arg1: memref<8x8xf32, #tpu.memory_space<vmem>>, %arg2: memref<8x128xf32, #tpu.memory_space<vmem>>, %arg3: memref<1x128xf32, #tpu.memory_space<vmem>>, %arg4: memref<3x128x128xf32, #tpu.memory_space<vmem>>, %arg5: memref<3x1x128xf32, #tpu.memory_space<vmem>>, %arg6: memref<128x2xf32, #tpu.memory_space<vmem>>, %arg7: memref<1x2xf32, #tpu.memory_space<vmem>>, %arg8: memref<8x2xf32, #tpu.memory_space<vmem>>) attributes {dimension_semantics = [#tpu.dimension_semantics<parallel>], iteration_bounds = array<i64: 2>, scalar_prefetch = 0 : i64, scratch_operands = 0 : i64, tpu.core_type = #tpu.core_type<tc>, window_params = [{transform_indices = @transform_0, window_bounds = array<i64: 8, 8>}, {pipeline_mode = #tpu.pipeline_mode<synchronous>, transform_indices = @transform_1, window_bounds = array<i64: 8, 128>}, {pipeline_mode = #tpu.pipeline_mode<synchronous>, transform_indices = @transform_2, window_bounds = array<i64: 1, 128>}, {pipeline_mode = #tpu.pipeline_mode<synchronous>, transform_indices = @transform_3, window_bounds = array<i64: 3, 128, 128>}, {pipeline_mode = #tpu.pipeline_mode<synchronous>, transform_indices = @transform_4, window_bounds = array<i64: 3, 1, 128>}, {pipeline_mode = #tpu.pipeline_mode<synchronous>, transform_indices = @transform_5, window_bounds = array<i64: 128, 2>}, {pipeline_mode = #tpu.pipeline_mode<synchronous>, transform_indices = @transform_6, window_bounds = array<i64: 1, 2>}, {transform_indices = @transform_7, window_bounds = array<i64: 8, 2>}]} {
    %c0 = arith.constant 0 : index
    %c0_0 = arith.constant 0 : index
    %0 = vector.load %arg1[%c0, %c0_0] : memref<8x8xf32, #tpu.memory_space<vmem>>, vector<8x8xf32>
    %c0_1 = arith.constant 0 : index
    %c0_2 = arith.constant 0 : index
    %1 = vector.load %arg2[%c0_1, %c0_2] : memref<8x128xf32, #tpu.memory_space<vmem>>, vector<8x128xf32>
    %cst = arith.constant dense<0.000000e+00> : vector<8x128xf32>
    %2 = tpu.matmul %0, %1, %cst {dimension_numbers = #tpu.dot_dimension_numbers<[1], [0], [0], [1], [0, 0, 1, 1], [], []>} : vector<8x8xf32>, vector<8x128xf32>, vector<8x128xf32> -> vector<8x128xf32>
    %c0_3 = arith.constant 0 : index
    %c0_4 = arith.constant 0 : index
    %3 = vector.load %arg3[%c0_3, %c0_4] : memref<1x128xf32, #tpu.memory_space<vmem>>, vector<1x128xf32>
    %4 = vector.broadcast %3 : vector<1x128xf32> to vector<8x128xf32>
    %5 = arith.addf %2, %4 : vector<8x128xf32>
    %cst_5 = arith.constant 0.000000e+00 : f32
    %6 = vector.broadcast %cst_5 : f32 to vector<8x128xf32>
    %7 = arith.maximumf %5, %6 : vector<8x128xf32>
    %c0_6 = arith.constant 0 : index
    %c0_7 = arith.constant 0 : index
    %c0_8 = arith.constant 0 : index
    %8 = vector.load %arg4[%c0_6, %c0_7, %c0_8] : memref<3x128x128xf32, #tpu.memory_space<vmem>>, vector<1x128x128xf32>
    %9 = vector.shape_cast %8 : vector<1x128x128xf32> to vector<128x128xf32>
    %cst_9 = arith.constant dense<0.000000e+00> : vector<8x128xf32>
    %10 = tpu.matmul %7, %9, %cst_9 {dimension_numbers = #tpu.dot_dimension_numbers<[1], [0], [0], [1], [0, 0, 1, 1], [], []>} : vector<8x128xf32>, vector<128x128xf32>, vector<8x128xf32> -> vector<8x128xf32>
    %c0_10 = arith.constant 0 : index
    %c0_11 = arith.constant 0 : index
    %c0_12 = arith.constant 0 : index
    %11 = vector.load %arg5[%c0_10, %c0_11, %c0_12] : memref<3x1x128xf32, #tpu.memory_space<vmem>>, vector<1x1x128xf32>
    %12 = vector.shape_cast %11 : vector<1x1x128xf32> to vector<1x128xf32>
    %13 = vector.broadcast %12 : vector<1x128xf32> to vector<8x128xf32>
    %14 = arith.addf %10, %13 : vector<8x128xf32>
    %cst_13 = arith.constant 0.000000e+00 : f32
    %15 = vector.broadcast %cst_13 : f32 to vector<8x128xf32>
    %16 = arith.maximumf %14, %15 : vector<8x128xf32>
    %c1 = arith.constant 1 : index
    %c0_14 = arith.constant 0 : index
    %c0_15 = arith.constant 0 : index
    %17 = vector.load %arg4[%c1, %c0_14, %c0_15] : memref<3x128x128xf32, #tpu.memory_space<vmem>>, vector<1x128x128xf32>
    %18 = vector.shape_cast %17 : vector<1x128x128xf32> to vector<128x128xf32>
    %cst_16 = arith.constant dense<0.000000e+00> : vector<8x128xf32>
    %19 = tpu.matmul %16, %18, %cst_16 {dimension_numbers = #tpu.dot_dimension_numbers<[1], [0], [0], [1], [0, 0, 1, 1], [], []>} : vector<8x128xf32>, vector<128x128xf32>, vector<8x128xf32> -> vector<8x128xf32>
    %c1_17 = arith.constant 1 : index
    %c0_18 = arith.constant 0 : index
    %c0_19 = arith.constant 0 : index
    %20 = vector.load %arg5[%c1_17, %c0_18, %c0_19] : memref<3x1x128xf32, #tpu.memory_space<vmem>>, vector<1x1x128xf32>
    %21 = vector.shape_cast %20 : vector<1x1x128xf32> to vector<1x128xf32>
    %22 = vector.broadcast %21 : vector<1x128xf32> to vector<8x128xf32>
    %23 = arith.addf %19, %22 : vector<8x128xf32>
    %cst_20 = arith.constant 0.000000e+00 : f32
    %24 = vector.broadcast %cst_20 : f32 to vector<8x128xf32>
    %25 = arith.maximumf %23, %24 : vector<8x128xf32>
    %c2 = arith.constant 2 : index
    %c0_21 = arith.constant 0 : index
    %c0_22 = arith.constant 0 : index
    %26 = vector.load %arg4[%c2, %c0_21, %c0_22] : memref<3x128x128xf32, #tpu.memory_space<vmem>>, vector<1x128x128xf32>
    %27 = vector.shape_cast %26 : vector<1x128x128xf32> to vector<128x128xf32>
    %cst_23 = arith.constant dense<0.000000e+00> : vector<8x128xf32>
    %28 = tpu.matmul %25, %27, %cst_23 {dimension_numbers = #tpu.dot_dimension_numbers<[1], [0], [0], [1], [0, 0, 1, 1], [], []>} : vector<8x128xf32>, vector<128x128xf32>, vector<8x128xf32> -> vector<8x128xf32>
    %c2_24 = arith.constant 2 : index
    %c0_25 = arith.constant 0 : index
    %c0_26 = arith.constant 0 : index
    %29 = vector.load %arg5[%c2_24, %c0_25, %c0_26] : memref<3x1x128xf32, #tpu.memory_space<vmem>>, vector<1x1x128xf32>
    %30 = vector.shape_cast %29 : vector<1x1x128xf32> to vector<1x128xf32>
    %31 = vector.broadcast %30 : vector<1x128xf32> to vector<8x128xf32>
    %32 = arith.addf %28, %31 : vector<8x128xf32>
    %cst_27 = arith.constant 0.000000e+00 : f32
    %33 = vector.broadcast %cst_27 : f32 to vector<8x128xf32>
    %34 = arith.maximumf %32, %33 : vector<8x128xf32>
    %c0_28 = arith.constant 0 : index
    %c0_29 = arith.constant 0 : index
    %35 = vector.load %arg6[%c0_28, %c0_29] : memref<128x2xf32, #tpu.memory_space<vmem>>, vector<128x2xf32>
    %cst_30 = arith.constant dense<0.000000e+00> : vector<8x2xf32>
    %36 = tpu.matmul %34, %35, %cst_30 {dimension_numbers = #tpu.dot_dimension_numbers<[1], [0], [0], [1], [0, 0, 1, 1], [], []>} : vector<8x128xf32>, vector<128x2xf32>, vector<8x2xf32> -> vector<8x2xf32>
    %c0_31 = arith.constant 0 : index
    %c0_32 = arith.constant 0 : index
    %37 = vector.load %arg7[%c0_31, %c0_32] : memref<1x2xf32, #tpu.memory_space<vmem>>, vector<1x2xf32>
    %38 = vector.broadcast %37 : vector<1x2xf32> to vector<8x2xf32>
    %39 = arith.addf %36, %38 : vector<8x2xf32>
    %c0_33 = arith.constant 0 : index
    %c0_34 = arith.constant 0 : index
    %40 = vector.load %arg8[%c0_33, %c0_34] : memref<8x2xf32, #tpu.memory_space<vmem>>, vector<8x2xf32>
    tpu.vector_store %arg8[%c0_33, %c0_34], %39 {strides = array<i32>} : memref<8x2xf32, #tpu.memory_space<vmem>>, vector<8x2xf32>,
    return
  }
  func.func @transform_0(%arg0: i32) -> (i32, i32) {
    %c0_i32 = arith.constant 0 : i32
    %c0_i32_0 = arith.constant 0 : i32
    return %arg0, %c0_i32 : i32, i32
  }
  func.func @transform_1(%arg0: i32) -> (i32, i32) {
    %c0_i32 = arith.constant 0 : i32
    %c0_i32_0 = arith.constant 0 : i32
    %c0_i32_1 = arith.constant 0 : i32
    return %c0_i32, %c0_i32_0 : i32, i32
  }
  func.func @transform_2(%arg0: i32) -> (i32, i32) {
    %c0_i32 = arith.constant 0 : i32
    %c0_i32_0 = arith.constant 0 : i32
    %c0_i32_1 = arith.constant 0 : i32
    return %c0_i32, %c0_i32_0 : i32, i32
  }
  func.func @transform_3(%arg0: i32) -> (i32, i32, i32) {
    %c0_i32 = arith.constant 0 : i32
    %c0_i32_0 = arith.constant 0 : i32
    %c0_i32_1 = arith.constant 0 : i32
    %c0_i32_2 = arith.constant 0 : i32
    return %c0_i32, %c0_i32_0, %c0_i32_1 : i32, i32, i32
  }
  func.func @transform_4(%arg0: i32) -> (i32, i32, i32) {
    %c0_i32 = arith.constant 0 : i32
    %c0_i32_0 = arith.constant 0 : i32
    %c0_i32_1 = arith.constant 0 : i32
    %c0_i32_2 = arith.constant 0 : i32
    return %c0_i32, %c0_i32_0, %c0_i32_1 : i32, i32, i32
  }
  func.func @transform_5(%arg0: i32) -> (i32, i32) {
    %c0_i32 = arith.constant 0 : i32
    %c0_i32_0 = arith.constant 0 : i32
    %c0_i32_1 = arith.constant 0 : i32
    return %c0_i32, %c0_i32_0 : i32, i32
  }
  func.func @transform_6(%arg0: i32) -> (i32, i32) {
    %c0_i32 = arith.constant 0 : i32
    %c0_i32_0 = arith.constant 0 : i32
    %c0_i32_1 = arith.constant 0 : i32
    return %c0_i32, %c0_i32_0 : i32, i32
  }
  func.func @transform_7(%arg0: i32) -> (i32, i32) {
    %c0_i32 = arith.constant 0 : i32
    %c0_i32_0 = arith.constant 0 : i32
    return %arg0, %c0_i32 : i32, i32
  }
}

</mosaic_0001>

<bundles_post_ra>
// kernel: tpu_custom_call.1
= control target key start
LH: loop header
LB: loop body
LE: loop exit
PB: predicated region body
PF: predicated region fallthrough
CT: control target
= control target key end

     0   :  { %12 = vsyncpa [#allocation3], 0  ;;  %s1259_s24 = smov 0   ;;  %s1431_s0 = inlined_call_operand.vmem [shape: f32[16,8], index: 0, kind: input, shape index: {}]   ;;  %s1432_s1 = inlined_call_operand.vmem [shape: f32[8,128], index: 1, kind: input, shape index: {}]   ;;  %s1433_s2 = inlined_call_operand.vmem [shape: f32[1,128], index: 2, kind: input, shape index: {}]   ;;  %s1434_s3 = inlined_call_operand.hbm [shape: f32[3,128,128], index: 3, kind: input, shape index: {}]   ;;  %s1435_s4 = inlined_call_operand.vmem [shape: f32[3,1,128], index: 4, kind: input, shape index: {}]   ;;  %s1436_s5 = inlined_call_operand.vmem [shape: f32[128,2], index: 5, kind: input, shape index: {}]   ;;  %s1437_s6 = inlined_call_operand.vmem [shape: f32[1,2], index: 6, kind: input, shape index: {}]   ;;  %s1438_s7 = inlined_call_operand.vmem [shape: f32[16,2], index: 7, kind: output, shape index: {}]  }
   0x1 LB: > { %s1265_s25 = sadd.s32 4294967295, %s1211_s24   ;;  %p821_p0 = scmp.ge.s32.totalorder %s1211_s24, 1  ;;  %s1211_s24 = sphi %s1259_s24, %s18_s24  }
   0x2   : > { %p201_p1 = scmp.lt.s32.totalorder %s1211_s24, 3  ;;  %s1213_s26 = smov [#allocation2]  }
   0x3   : > { %s219_s27 = sshll.u32 %s1213_s26, 4  ;;  %p1439_p3 = scmp.eq.s32.totalorder %s1265_s25, 0  ;;  %s220_s27 = int_to_ptr.vmem [resolvable:$true] %s219_s27 }
   0x4   : > { %p1269_p2 = pnand %p821_p0, %p201_p1  ;;  %s1173_s9 = scalar_lea.hbm %s1434_s3, 6144 }
   0x5   : > { %p1174_p6 = scmp.ne.s32.totalorder %s1434_s3, %s1173_s9  ;;  %p1180_p10 = scmp.lt.u32.totalorder %s1173_s9, %s1434_s3 }
   0x6   : > { %s1441_s28 = scalar_select %p1269_p2, 1, 0 }
   0x7   : > { %p1153_p4 = pneg %p1269_p2 }
   0x9   : > { %p1278_p5 = pnand %p1439_p3, %p1153_p4 }
   0xb   : > { %p1175_p7 = pneg %p1278_p5 }
   0xd   : > { %p1176_p8 = pnand %p1175_p7, %p1174_p6 }
   0xf   : > { %p1177_p9 = pneg %p1176_p8 }
  0x11   : > { %p1182_p11 = pnand %p1180_p10, %p1177_p9 }
  0x13   : > { %1185 = shalt.err (!%p1182_p11)
}
  0x14   : > { %s1186_s14 = scalar_lea.vmem %s220_s27, 6144  ;;  %p1194_p1 = scmp.lt.s32.totalorder %s220_s27, %s220_s27 }
  0x15   : > { %p1187_p12 = scmp.ne.s32.totalorder %s220_s27, %s1186_s14  ;;  %p1195_p4 = scmp.lt.s32.totalorder %s1186_s14, %s1186_s14 }
  0x17   : > { %p1189_p13 = pnand %p1187_p12, %p1175_p7  ;;  %p1196_p3 = por %p1195_p4, %p1194_p1 }
  0x19   : > { %p1190_p0 = pneg %p1189_p13 }
  0x1b   : > { %p1197_p2 = pnand %p1196_p3, %p1190_p0 }
  0x1d   : > { %1200 = shalt.err (!%p1197_p2)
}
  0x1e   : > { %s1214_s15 = smov 128   ;;  %s1215_s16 = smov 8  }
  0x1f   : > { %1156 = dma.hbm_to_vmem [thread:$0]  (!%p1278_p5), %s1434_s3, 6144, %s220_s27, [#allocation3], %s1214_s15, %s1214_s15, %s1215_s16  }
  0x20   : > { %p1443_p6 = scmp.ne.s32.totalorder %s1441_s28, 0 }
  0x21   : > { %p1444_p8 = scmp.eq.s32.totalorder (!%p1443_p6), %s1265_s25, 0 }
  0x22   : > { %251 = sbr.rel (%p1443_p6) target bundleno = 1127 (0x467), region = 48 }
  0x29   : > { %1206 = dma.done.wait (%p1444_p8), [#allocation3], 6144   ;;  %p1445_p7 = pmov %p1444_p8 }
  0x2a   : > { %p281_p2 = scmp.lt.s32.totalorder %s1265_s25, 1  ;;  %v1216_v0 = vmov 0.0   ;;  %vm1217_vm0 = vmmov 0   ;;  %v1218_v1 = vmov 0.0|0.0   ;;  %vm298_vm1 = vcmask 64512   ;;  %v290_v2 = vld [vmem:[%s1432_s1] sm:$0xff] }
  0x2b   : > { %1208 = vsyncadd (%p1445_p7), [#allocation3], 4294961152  ;;  %908 = vmatprep.subr.mxu0 %v1216_v0  ;;  %910 = vmatprep.mubr.msk.f32.mxu0 %vm1217_vm0, %v1216_v0  ;;  %v373_v4 = vld [vmem:[#allocation2] sm:$0xff]  ;;  %v374_v5 = vld [vmem:[#allocation2 + $0x8] sm:$0xff]  ;;  %vm752_vm2 = vcmask 15360  }
  0x2c   : > { %s1447_s25 = smov (!%p281_p2, %s1265_s25), 1  ;;  %1053 = vmatprep.subr.bf16.mxu1 %v1218_v1  ;;  %945 = vmatprep.mubr.msk.f32.mxu1 %vm1217_vm0, %v1216_v0  ;;  %v375_v6 = vld [vmem:[#allocation2 + $0x10] sm:$0xff]  ;;  %v376_v7 = vld [vmem:[#allocation2 + $0x18] sm:$0xff]  ;;  %v1054_v8 = vpack.c.bf16 %v374_v5, %v373_v4  ;;  %v377_v10 = vld [vmem:[#allocation2 + $0x20] sm:$0xff] }
  0x2d   : > { %s826_s19 = sshll.u32 %s1447_s25, 3  ;;  %909 = vmatpush3.msra.mxu0 %v290_v2  ;;  %v1057_v9 = vpack.c.bf16 %v376_v7, %v375_v6  ;;  %v378_v11 = vld [vmem:[#allocation2 + $0x28] sm:$0xff]  ;;  %v379_v13 = vld [vmem:[#allocation2 + $0x30] sm:$0xff]  ;;  %v380_v14 = vld [vmem:[#allocation2 + $0x38] sm:$0xff] }
  0x2e   : > { %s284_s22 = scalar_lea.vmem %s1431_s0, %s826_s19  ;;  %1077 = vmatprep.subr.bf16.mxu0 %v1218_v1  ;;  %1055 = vmatpush3.bf16.msra.mxu1 %v1054_v8  ;;  %v1060_v12 = vpack.c.bf16 %v378_v11, %v377_v10  ;;  %v1063_v15 = vpack.c.bf16 %v380_v14, %v379_v13  ;;  %v381_v16 = vld [vmem:[#allocation2 + $0x40] sm:$0xff]  ;;  %v382_v17 = vld [vmem:[#allocation2 + $0x48] sm:$0xff]  ;;  %v383_v19 = vld [vmem:[#allocation2 + $0x50] sm:$0xff]  ;;  %s288_s8 = scalar_lea.vmem %s1438_s7, %s826_s19 }
  0x2f   : > { %v289_v3 = vld [vmem:[%s284_s22] sm:$0xff]  ;;  %1056 = vmatprep.subr.bf16.mxu1 %v1218_v1  ;;  %v1066_v18 = vpack.c.bf16 %v382_v17, %v381_v16  ;;  %v384_v20 = vld [vmem:[#allocation2 + $0x58] sm:$0xff]  ;;  %v386_v23 = vld [vmem:[#allocation2 + $0x68] sm:$0xff] }
  0x30   : > { %911 = vmatmul.mubr.msk.f32.vlgmr.msra.gmra.mrb[0].mxu0 %vm298_vm1, %v289_v3  ;;  %v1069_v21 = vpack.c.bf16 %v384_v20, %v383_v19  ;;  %v385_v22 = vld [vmem:[#allocation2 + $0x60] sm:$0xff]  ;;  %v387_v25 = vld [vmem:[#allocation2 + $0x70] sm:$0xff]  ;;  %v388_v26 = vld [vmem:[#allocation2 + $0x78] sm:$0xff] }
  0x31   : > { %980 = vmatprep.mubr.msk.f32.mxu0 %vm1217_vm0, %v1216_v0  ;;  %v1072_v24 = vpack.c.bf16 %v386_v23, %v385_v22  ;;  %v1075_v27 = vpack.c.bf16 %v388_v26, %v387_v25  ;;  %v468_v28 = vld [vmem:[#allocation2 + $0x80] sm:$0xff]  ;;  %v469_v29 = vld [vmem:[#allocation2 + $0x88] sm:$0xff]  ;;  %v470_v30 = vld [vmem:[#allocation2 + $0x90] sm:$0xff] }
  0x32   : > { %1058 = vmatpush3.bf16.msra.mxu1 %v1057_v9  ;;  %v1078_v31 = vpack.c.bf16 %v469_v29, %v468_v28  ;;  %v471_v32 = vld [vmem:[#allocation2 + $0x98] sm:$0xff]  ;;  %v472_v34 = vld [vmem:[#allocation2 + $0xa0] sm:$0xff]  ;;  %v473_v35 = vld [vmem:[#allocation2 + $0xa8] sm:$0xff] }
  0x33   : > { %1059 = vmatprep.subr.bf16.mxu1 %v1218_v1  ;;  %v1081_v33 = vpack.c.bf16 %v471_v32, %v470_v30  ;;  %v1084_v36 = vpack.c.bf16 %v473_v35, %v472_v34  ;;  %v474_v37 = vld [vmem:[#allocation2 + $0xb0] sm:$0xff]  ;;  %v475_v38 = vld [vmem:[#allocation2 + $0xb8] sm:$0xff]  ;;  %v476_v40 = vld [vmem:[#allocation2 + $0xc0] sm:$0xff] }
  0x34   : > { %1079 = vmatpush3.bf16.msra.mxu0 %v1078_v31  ;;  %v1087_v39 = vpack.c.bf16 %v475_v38, %v474_v37  ;;  %v477_v41 = vld [vmem:[#allocation2 + $0xc8] sm:$0xff]  ;;  %v478_v43 = vld [vmem:[#allocation2 + $0xd0] sm:$0xff]  ;;  %v479_v44 = vld [vmem:[#allocation2 + $0xd8] sm:$0xff] }
  0x35   : > { %1080 = vmatprep.subr.bf16.mxu0 %v1218_v1  ;;  %v1090_v42 = vpack.c.bf16 %v477_v41, %v476_v40  ;;  %v1093_v45 = vpack.c.bf16 %v479_v44, %v478_v43  ;;  %v480_v46 = vld [vmem:[#allocation2 + $0xe0] sm:$0xff]  ;;  %v481_v47 = vld [vmem:[#allocation2 + $0xe8] sm:$0xff]  ;;  %v482_v54 = vld [vmem:[#allocation2 + $0xf0] sm:$0xff] }
  0x36   : > { %1061 = vmatpush3.bf16.msra.mxu1 %v1060_v12  ;;  %v1096_v48 = vpack.c.bf16 %v481_v47, %v480_v46  ;;  %v828_v49 = vld [vmem:[%s1433_s2] ss:$0 sm:$0xff]  ;;  %v483_v55 = vld [vmem:[#allocation2 + $0xf8] sm:$0xff]  ;;  %v565_v58 = vld [vmem:[#allocation2 + $0x108] sm:$0xff] }
  0x37   : > { %1062 = vmatprep.subr.bf16.mxu1 %v1218_v1  ;;  %v1099_v56 = vpack.c.bf16 %v483_v55, %v482_v54  ;;  %v564_v57 = vld [vmem:[#allocation2 + $0x100] sm:$0xff]  ;;  %v566_v59 = vld [vmem:[#allocation2 + $0x110] sm:$0xff]  ;;  %v567_v61 = vld [vmem:[#allocation2 + $0x118] sm:$0xff] }
  0x38   : > { %1082 = vmatpush3.bf16.msra.mxu0 %v1081_v33  ;;  %v1102_v60 = vpack.c.bf16 %v565_v58, %v564_v57  ;;  %v1105_v62 = vpack.c.bf16 %v567_v61, %v566_v59  ;;  %v568_v63 = vld [vmem:[#allocation2 + $0x120] sm:$0xff]  ;;  %v569_v2 = vld [vmem:[#allocation2 + $0x128] sm:$0xff]  ;;  %v570_v4 = vld [vmem:[#allocation2 + $0x130] sm:$0xff] }
  0x39   : > { %1083 = vmatprep.subr.bf16.mxu0 %v1218_v1  ;;  %v1108_v3 = vpack.c.bf16 %v569_v2, %v568_v63  ;;  %v571_v5 = vld [vmem:[#allocation2 + $0x138] sm:$0xff]  ;;  %v572_v7 = vld [vmem:[#allocation2 + $0x140] sm:$0xff]  ;;  %v573_v8 = vld [vmem:[#allocation2 + $0x148] sm:$0xff] }
  0x3a   : > { %1064 = vmatpush3.bf16.msra.mxu1 %v1063_v15  ;;  %v1111_v6 = vpack.c.bf16 %v571_v5, %v570_v4  ;;  %v1114_v9 = vpack.c.bf16 %v573_v8, %v572_v7  ;;  %v574_v10 = vld [vmem:[#allocation2 + $0x150] sm:$0xff]  ;;  %v575_v11 = vld [vmem:[#allocation2 + $0x158] sm:$0xff]  ;;  %v576_v13 = vld [vmem:[#allocation2 + $0x160] sm:$0xff] }
  0x3b   : > { %1065 = vmatprep.subr.bf16.mxu1 %v1218_v1  ;;  %v1117_v12 = vpack.c.bf16 %v575_v11, %v574_v10  ;;  %v577_v14 = vld [vmem:[#allocation2 + $0x168] sm:$0xff]  ;;  %v830_v16 = vld [vmem:[%s1435_s4] ss:$0 sm:$0xff]  ;;  %v579_v22 = vld [vmem:[#allocation2 + $0x178] sm:$0xff] }
  0x3c   : > { %1085 = vmatpush3.bf16.msra.mxu0 %v1084_v36  ;;  %v1120_v15 = vpack.c.bf16 %v577_v14, %v576_v13  ;;  %v660_v25 = vld [vmem:[%s1436_s5 + $0x8] sm:$0xff]  ;;  %v661_v26 = vld [vmem:[%s1436_s5 + $0x10] sm:$0xff]  ;;  %v663_v29 = vld [vmem:[%s1436_s5 + $0x20] sm:$0xff] }
  0x3d   : > { %1086 = vmatprep.subr.bf16.mxu0 %v1218_v1  ;;  %v664_v30 = vld [vmem:[%s1436_s5 + $0x28] sm:$0xff]  ;;  %v665_v32 = vld [vmem:[%s1436_s5 + $0x30] sm:$0xff]  ;;  %v666_v33 = vld [vmem:[%s1436_s5 + $0x38] sm:$0xff] }
  0x3e   : > { %1067 = vmatpush3.bf16.msra.mxu1 %v1066_v18  ;;  %v1132_v31 = vpack.c.bf16 %v664_v30, %v663_v29  ;;  %v1135_v34 = vpack.c.bf16 %v666_v33, %v665_v32  ;;  %v667_v35 = vld [vmem:[%s1436_s5 + $0x40] sm:$0xff]  ;;  %v668_v36 = vld [vmem:[%s1436_s5 + $0x48] sm:$0xff]  ;;  %v669_v38 = vld [vmem:[%s1436_s5 + $0x50] sm:$0xff] }
  0x3f   : > { %1068 = vmatprep.subr.bf16.mxu1 %v1218_v1  ;;  %v1138_v37 = vpack.c.bf16 %v668_v36, %v667_v35  ;;  %v671_v41 = vld [vmem:[%s1436_s5 + $0x60] sm:$0xff] }
  0x40   : > { %1088 = vmatpush3.bf16.msra.mxu0 %v1087_v39  ;;  %v670_v39 = vld [vmem:[%s1436_s5 + $0x58] sm:$0xff]  ;;  %v832_v44 = vld [vmem:[%s1435_s4 + $0x1] ss:$0 sm:$0xff] }
  0x41   : > { %1089 = vmatprep.subr.bf16.mxu0 %v1218_v1  ;;  %v1141_v40 = vpack.c.bf16 %v670_v39, %v669_v38 }
  0x42   : > { %1070 = vmatpush3.bf16.msra.mxu1 %v1069_v21  ;;  %v578_v21 = vld [vmem:[#allocation2 + $0x170] sm:$0xff] }
  0x43   : > { %1071 = vmatprep.subr.bf16.mxu1 %v1218_v1  ;;  %v1123_v23 = vpack.c.bf16 %v579_v22, %v578_v21 }
  0x44   : > { %1091 = vmatpush3.bf16.msra.mxu0 %v1090_v42  ;;  %v672_v42 = vld [vmem:[%s1436_s5 + $0x68] sm:$0xff] }
  0x45   : > { %1092 = vmatprep.subr.bf16.mxu0 %v1218_v1  ;;  %v1144_v43 = vpack.c.bf16 %v672_v42, %v671_v41 }
  0x46   : > { %1073 = vmatpush3.bf16.msra.mxu1 %v1072_v24  ;;  %v659_v24 = vld [vmem:[%s1436_s5] sm:$0xff] }
  0x47   : > { %1074 = vmatprep.subr.bf16.mxu1 %v1218_v1 }
  0x48   : > { %1094 = vmatpush3.bf16.msra.mxu0 %v1093_v45 }
  0x49   : > { %1095 = vmatprep.subr.bf16.mxu0 %v1218_v1 }
  0x4a   : > { %1076 = vmatpush3.bf16.msra.mxu1 %v1075_v27  ;;  %v1126_v27 = vpack.c.bf16 %v660_v25, %v659_v24 }
  0x4b   : > { %1101 = vmatprep.subr.bf16.mxu1 %v1218_v1 }
  0x4c   : > { %1097 = vmatpush3.bf16.msra.mxu0 %v1096_v48 }
  0x4d   : > { %1098 = vmatprep.subr.bf16.mxu0 %v1218_v1 }
  0x50   : > { %1100 = vmatpush3.bf16.msra.mxu0 %v1099_v56  ;;  %v835_v56 = vld [vmem:[%s1437_s6] ss:$0 sm:$0xff] }
  0x51   : > { %1125 = vmatprep.subr.bf16.mxu0 %v1218_v1 }
 0x103   : > { %v368_v50 = vpop.f32.mrb[0].mxu0 }
 0x104   : > { %v369_v51 = vadd.f32 %v828_v49, %v368_v50  ;;  %v912_v52 = vpop.f32.mrb[1].mxu0  ;;  %v673_v49 = vld [vmem:[%s1436_s5 + $0x70] sm:$0xff]  ;;  %v674_v50 = vld [vmem:[%s1436_s5 + $0x78] sm:$0xff] }
 0x106   : > { %v372_v53 = vmax.f32 %v369_v51, 0.0  ;;  %v1147_v51 = vpack.c.bf16 %v674_v50, %v673_v49 }
 0x108   : > { %946 = vmatmul.mubr.f32.vlgmr.msra.gmra.mrb[0].mxu1 %v372_v53 }
 0x109   : > { %1015 = vmatprep.mubr.msk.f32.mxu1 %vm1217_vm0, %v1216_v0  ;;  %1103 = vmatpush3.bf16.msra.mxu1 %v1102_v60 }
 0x10a   : > { %1104 = vmatprep.subr.bf16.mxu1 %v1218_v1 }
 0x10d   : > { %1106 = vmatpush3.bf16.msra.mxu1 %v1105_v62 }
 0x10e   : > { %1107 = vmatprep.subr.bf16.mxu1 %v1218_v1 }
 0x111   : > { %1109 = vmatpush3.bf16.msra.mxu1 %v1108_v3 }
 0x112   : > { %1110 = vmatprep.subr.bf16.mxu1 %v1218_v1 }
 0x115   : > { %1112 = vmatpush3.bf16.msra.mxu1 %v1111_v6 }
 0x116   : > { %1113 = vmatprep.subr.bf16.mxu1 %v1218_v1 }
 0x119   : > { %1115 = vmatpush3.bf16.msra.mxu1 %v1114_v9 }
 0x11a   : > { %1116 = vmatprep.subr.bf16.mxu1 %v1218_v1 }
 0x11d   : > { %1118 = vmatpush3.bf16.msra.mxu1 %v1117_v12 }
 0x11e   : > { %1119 = vmatprep.subr.bf16.mxu1 %v1218_v1 }
 0x121   : > { %1121 = vmatpush3.bf16.msra.mxu1 %v1120_v15 }
 0x122   : > { %1122 = vmatprep.subr.bf16.mxu1 %v1218_v1 }
 0x125   : > { %1124 = vmatpush3.bf16.msra.mxu1 %v1123_v23 }
 0x1db   : > { %v462_v17 = vpop.f32.mrb[0].mxu1 }
 0x1dc   : > { %v463_v18 = vadd.f32 %v830_v16, %v462_v17  ;;  %v947_v19 = vpop.f32.mrb[1].mxu1 }
 0x1de   : > { %v466_v20 = vmax.f32 %v463_v18, 0.0 }
 0x1e0   : > { %981 = vmatmul.mubr.f32.vlgmr.msra.gmra.mrb[2].mxu0 %v466_v20 }
 0x1e1   : > { %1050 = vmatprep.mubr.msk.f32.mxu0 %vm1217_vm0, %v1216_v0  ;;  %v662_v0 = vld [vmem:[%s1436_s5 + $0x18] sm:$0xff]  ;;  %1127 = vmatpush3.bf16.msra.mxu0 %v1126_v27 }
 0x1e2   : > { %v1129_v28 = vpack.c.bf16 %v662_v0, %v661_v26  ;;  %1128 = vmatprep.subr.bf16.mxu0 %v1218_v1 }
 0x1e5   : > { %1130 = vmatpush3.bf16.msra.mxu0 %v1129_v28 }
 0x1e6   : > { %1131 = vmatprep.subr.bf16.mxu0 %v1218_v1 }
 0x1e9   : > { %1133 = vmatpush3.bf16.msra.mxu0 %v1132_v31 }
 0x1ea   : > { %1134 = vmatprep.subr.bf16.mxu0 %v1218_v1 }
 0x1ed   : > { %1136 = vmatpush3.bf16.msra.mxu0 %v1135_v34 }
 0x1ee   : > { %1137 = vmatprep.subr.bf16.mxu0 %v1218_v1 }
 0x1f1   : > { %1139 = vmatpush3.bf16.msra.mxu0 %v1138_v37 }
 0x1f2   : > { %1140 = vmatprep.subr.bf16.mxu0 %v1218_v1 }
 0x1f5   : > { %1142 = vmatpush3.bf16.msra.mxu0 %v1141_v40 }
 0x1f6   : > { %1143 = vmatprep.subr.bf16.mxu0 %v1218_v1 }
 0x1f9   : > { %1145 = vmatpush3.bf16.msra.mxu0 %v1144_v43 }
 0x1fa   : > { %1146 = vmatprep.subr.bf16.mxu0 %v1218_v1  ;;  %v834_v1 = vld [vmem:[%s1435_s4 + $0x2] ss:$0 sm:$0xff] }
 0x1fd   : > { %1148 = vmatpush3.bf16.msra.mxu0 %v1147_v51 }
 0x2b3   : > { %v558_v45 = vpop.f32.mrb[2].mxu0 }
 0x2b4   : > { %v559_v46 = vadd.f32 %v832_v44, %v558_v45  ;;  %v982_v47 = vpop.f32.mrb[3].mxu0 }
 0x2b6   : > { %v562_v48 = vmax.f32 %v559_v46, 0.0 }
 0x2b8   : > { %1016 = vmatmul.mubr.f32.vlgmr.msra.gmra.mrb[2].mxu1 %v562_v48 }
 0x38b   : > { %v654_v52 = vpop.f32.mrb[2].mxu1 }
 0x38c   : > { %v655_v53 = vadd.f32 %v834_v1, %v654_v52  ;;  %v1017_v54 = vpop.f32.mrb[3].mxu1 }
 0x38e   : > { %v658_v55 = vmax.f32 %v655_v53, 0.0 }
 0x390   : > { %1051 = vmatmul.mubr.f32.vlgmr.msra.gmra.mrb[4].mxu0 %v658_v55 }
 0x463   : > { %v748_v57 = vpop.f32.mrb[4].mxu0 }
 0x464   : > { %v749_v58 = vadd.f32 %v835_v56, %v748_v57  ;;  %v1052_v59 = vpop.f32.mrb[5].mxu0 }
 0x466   : > { %753 = vst.msk [vmem:[%s288_s8] sm:$0xff] %vm752_vm2, %v749_v58 }
 0x467 PF: > { %s18_s24 = sadd.s32 1, %s1211_s24  }
 0x468   : > { %p15_p3 = scmp.ge.s32.totalorder %s18_s24, 4  }
 0x46a   :  { %17 = sbr.rel (!%p15_p3) target bundleno = 1 (0x1), region = 87 }
 0x471   :  { %773 = vsyncpa [#allocation3], 1 }
 0x472   :  { %775 = vsyncpa [#allocation3 + $0x1], 1 }

</bundles_post_ra>
